<compile_context>
chip_gen: v7x
topology: tpu7x:2x2x1
jax: 0.10.0
libtpu: 0.0.40
codegen_flags: <defaults>
</compile_context>

<pallas_src>
import functools

import jax
import jax.numpy as jnp
from jax.experimental import pallas as pl
from jax.experimental.pallas import tpu as pltpu

hidden_size = 20
input_size = 5
sentence = 'We are going to watch Avengers End Game'.split()
vocab = {tkn: i for i, tkn in enumerate(sentence, 1)}
vocab_size = len(vocab)  # 8


def rnn_fused_kernel(onehot_ref, embp_ref, whh_ref, b_ref, wout_ref, bout_ref,
                     out_ref, *, B, T):
    """Whole forward in one invocation.

    onehot_ref: (N, V) f32 one-hot token rows, TIME-major (row = t*B + b)
    embp_ref  : (V, H) fused embedding + input projection (emb_tbl @ W_ih^T)
    whh_ref   : (H, H) W_hh^T
    b_ref     : (1, H) b_ih + b_hh
    wout_ref  : (H, V) W_out^T
    bout_ref  : (1, V) b_out
    out_ref   : (B*T, V) logits, BATCH-major rows (row = b*T + t)
    """
    H = whh_ref.shape[0]
    N = B * T

    # Hoisted, fused embedding lookup + input projection + bias for ALL steps:
    # ONE MXU pass (one-hot @ (emb @ W_ih^T)).
    xp = jnp.dot(onehot_ref[...], embp_ref[...],
                 preferred_element_type=jnp.float32) + b_ref[...]      # (N, H)

    w_hh = whh_ref[...]

    # Row-index plane for the register-resident batch-major assembly of the
    # hidden-state history (no VMEM scratch, no scatter stores).
    row = jax.lax.broadcasted_iota(jnp.int32, (N, H), 0)

    h = jnp.zeros((B, H), jnp.float32)
    hs = jnp.zeros((N, H), jnp.float32)   # batch-major hidden history, in vregs

    # Serial recurrence, fully unrolled (T small & static).  Only
    # h @ W_hh + tanh sits on the dependency chain; the compare+select
    # assembly below is independent VPU filler.
    for t in range(T):
        x_t = xp[t * B:(t + 1) * B, :]               # contiguous static slice
        h = jnp.tanh(x_t + jnp.dot(h, w_hh, preferred_element_type=jnp.float32))
        for b in range(B):
            hs = jnp.where(row == b * T + t,
                           jnp.broadcast_to(h[b:b + 1, :], (N, H)),
                           hs)

    # Hoisted output projection: ONE matmul + ONE full-block store, already in
    # PyTorch's batch-first `view(-1, V)` row order.
    out_ref[...] = (jnp.dot(hs, wout_ref[...],
                            preferred_element_type=jnp.float32) + bout_ref[...])


def rnn_forward_pallas(onehot_tm, emb_proj, w_hh_t, b, w_out_t, b_out, *, B, T):
    V = onehot_tm.shape[1]
    H = w_hh_t.shape[0]
    N = B * T
    kernel = functools.partial(rnn_fused_kernel, B=B, T=T)
    return pl.pallas_call(
        kernel,
        out_shape=jax.ShapeDtypeStruct((N, V), jnp.float32),
        grid_spec=pltpu.PrefetchScalarGridSpec(
            num_scalar_prefetch=0,
            grid=(1,),                     # single invocation, whole arrays in VMEM
            in_specs=[
                pl.BlockSpec((N, V), lambda i: (0, 0)),   # one-hot tokens
                pl.BlockSpec((V, H), lambda i: (0, 0)),   # emb @ W_ih^T
                pl.BlockSpec((H, H), lambda i: (0, 0)),   # W_hh^T
                pl.BlockSpec((1, H), lambda i: (0, 0)),   # b_ih + b_hh
                pl.BlockSpec((H, V), lambda i: (0, 0)),   # W_out^T
                pl.BlockSpec((1, V), lambda i: (0, 0)),   # b_out
            ],
            out_specs=pl.BlockSpec((N, V), lambda i: (0, 0)),
        ),
        compiler_params=pltpu.CompilerParams(
            dimension_semantics=("arbitrary",)),
    )(onehot_tm, emb_proj, w_hh_t, b, w_out_t, b_out)


@jax.jit
def net_forward(x_idx, params):
    """x_idx: int32 (B, T). Returns (B*T, vocab_size) float32, PyTorch-equivalent."""
    emb_tbl, w_ih, w_hh, b_ih, b_hh, w_lin, b_lin = params
    B, T = x_idx.shape
    V = emb_tbl.shape[0]
    # Tiny wrapper glue: time-major (T*B, V) one-hot of the token ids (512 B).
    # NOTE: like the one-hot gather, out-of-range ids map to a zero embedding
    # row (nn.Embedding would raise); in-range ids (0..V-1) match exactly.
    ids_tm = x_idx.astype(jnp.int32).T.reshape(T * B, 1)
    onehot_tm = (ids_tm == jnp.arange(V, dtype=jnp.int32)[None, :]).astype(jnp.float32)
    emb_proj = emb_tbl @ w_ih.T            # (V, H) fused embedding + input proj
    return rnn_forward_pallas(
        onehot_tm, emb_proj,
        w_hh.T,                            # (H, H)
        (b_ih + b_hh)[None, :],            # (1, H)
        w_lin.T,                           # (H, V)
        b_lin[None, :],                    # (1, V)
        B=B, T=T)


def net_forward_ref(x_idx, params):
    """Pure-JAX reference (HIGHEST precision) for correctness check."""
    emb_tbl, w_ih, w_hh, b_ih, b_hh, w_lin, b_lin = params
    hp = jax.lax.Precision.HIGHEST
    emb = emb_tbl[x_idx]                       # (B, T, I)
    B, T, _ = emb.shape
    H = w_ih.shape[0]

    def step(h, x_t):
        h_new = jnp.tanh(jnp.dot(x_t, w_ih.T, precision=hp) + b_ih
                         + jnp.dot(h, w_hh.T, precision=hp) + b_hh)
        return h_new, h_new

    _, hs = jax.lax.scan(step, jnp.zeros((B, H), jnp.float32),
                         jnp.transpose(emb, (1, 0, 2)))
    hs = jnp.transpose(hs, (1, 0, 2))          # (B, T, H)
    out = jnp.dot(hs, w_lin.T, precision=hp) + b_lin
    return out.reshape(-1, out.shape[2])


def init_params(key):
    kE, k1, k2, k3, k4, k5, k6 = jax.random.split(key, 7)
    H, I, V = hidden_size, input_size, vocab_size
    s = 1.0 / jnp.sqrt(H)
    emb_tbl = jax.random.normal(kE, (V, I), jnp.float32)
    w_ih = jax.random.uniform(k1, (H, I), jnp.float32, -s, s)
    w_hh = jax.random.uniform(k2, (H, H), jnp.float32, -s, s)
    b_ih = jax.random.uniform(k3, (H,), jnp.float32, -s, s)
    b_hh = jax.random.uniform(k4, (H,), jnp.float32, -s, s)
    w_lin = jax.random.uniform(k5, (V, H), jnp.float32, -s, s)
    b_lin = jax.random.uniform(k6, (V,), jnp.float32, -s, s)
    return emb_tbl, w_ih, w_hh, b_ih, b_hh, w_lin, b_lin


if __name__ == "__main__":
    key = jax.random.PRNGKey(0)
    params = init_params(key)

    B, T = 2, 8  # batch=2, seq length = len(sentence) = 8
    x_idx = jax.random.randint(jax.random.PRNGKey(1), (B, T), 0, vocab_size,
                               dtype=jnp.int32)

    out = net_forward(x_idx, params)
    out = jax.block_until_ready(out)

    ref = net_forward_ref(x_idx, params)
    assert out.shape == (B * T, vocab_size), out.shape
    assert jnp.allclose(out, ref, atol=1e-3, rtol=1e-3), "mismatch vs reference"
    print("KERNEL_OK")
</pallas_src>

<mosaic_0001>
module attributes {stable_mosaic.version = 11 : i64} {
  func.func @rnn_fused_kernel(%arg0: i32, %arg1: memref<16x8xf32, #tpu.memory_space<vmem>>, %arg2: memref<8x20xf32, #tpu.memory_space<vmem>>, %arg3: memref<20x20xf32, #tpu.memory_space<vmem>>, %arg4: memref<1x20xf32, #tpu.memory_space<vmem>>, %arg5: memref<20x8xf32, #tpu.memory_space<vmem>>, %arg6: memref<1x8xf32, #tpu.memory_space<vmem>>, %arg7: memref<16x8xf32, #tpu.memory_space<vmem>>) attributes {dimension_semantics = [#tpu.dimension_semantics<arbitrary>], iteration_bounds = array<i64: 1>, scalar_prefetch = 0 : i64, scratch_operands = 0 : i64, tpu.core_type = #tpu.core_type<tc>, window_params = [{pipeline_mode = #tpu.pipeline_mode<synchronous>, transform_indices = @transform_0, window_bounds = array<i64: 16, 8>}, {pipeline_mode = #tpu.pipeline_mode<synchronous>, transform_indices = @transform_1, window_bounds = array<i64: 8, 20>}, {pipeline_mode = #tpu.pipeline_mode<synchronous>, transform_indices = @transform_2, window_bounds = array<i64: 20, 20>}, {pipeline_mode = #tpu.pipeline_mode<synchronous>, transform_indices = @transform_3, window_bounds = array<i64: 1, 20>}, {pipeline_mode = #tpu.pipeline_mode<synchronous>, transform_indices = @transform_4, window_bounds = array<i64: 20, 8>}, {pipeline_mode = #tpu.pipeline_mode<synchronous>, transform_indices = @transform_5, window_bounds = array<i64: 1, 8>}, {pipeline_mode = #tpu.pipeline_mode<synchronous>, transform_indices = @transform_6, window_bounds = array<i64: 16, 8>}]} {
    %c0 = arith.constant 0 : index
    %c0_0 = arith.constant 0 : index
    %0 = vector.load %arg1[%c0, %c0_0] : memref<16x8xf32, #tpu.memory_space<vmem>>, vector<16x8xf32>
    %c0_1 = arith.constant 0 : index
    %c0_2 = arith.constant 0 : index
    %1 = vector.load %arg2[%c0_1, %c0_2] : memref<8x20xf32, #tpu.memory_space<vmem>>, vector<8x20xf32>
    %cst = arith.constant dense<0.000000e+00> : vector<16x20xf32>
    %2 = tpu.matmul %0, %1, %cst {dimension_numbers = #tpu.dot_dimension_numbers<[1], [0], [0], [1], [0, 0, 1, 1], [], []>} : vector<16x8xf32>, vector<8x20xf32>, vector<16x20xf32> -> vector<16x20xf32>
    %c0_3 = arith.constant 0 : index
    %c0_4 = arith.constant 0 : index
    %3 = vector.load %arg4[%c0_3, %c0_4] : memref<1x20xf32, #tpu.memory_space<vmem>>, vector<1x20xf32>
    %4 = vector.broadcast %3 : vector<1x20xf32> to vector<16x20xf32>
    %5 = arith.addf %2, %4 : vector<16x20xf32>
    %c0_5 = arith.constant 0 : index
    %c0_6 = arith.constant 0 : index
    %6 = vector.load %arg3[%c0_5, %c0_6] : memref<20x20xf32, #tpu.memory_space<vmem>>, vector<20x20xf32>
    %7 = tpu.iota {dimensions = array<i32: 0>} : vector<16x20xi32>
    %cst_7 = arith.constant 0.000000e+00 : f32
    %8 = vector.broadcast %cst_7 : f32 to vector<2x20xf32>
    %cst_8 = arith.constant 0.000000e+00 : f32
    %9 = vector.broadcast %cst_8 : f32 to vector<16x20xf32>
    %10 = vector.extract_strided_slice %5 {offsets = [0, 0], sizes = [2, 20], strides = [1, 1]} : vector<16x20xf32> to vector<2x20xf32>
    %cst_9 = arith.constant dense<0.000000e+00> : vector<2x20xf32>
    %11 = tpu.matmul %8, %6, %cst_9 {dimension_numbers = #tpu.dot_dimension_numbers<[1], [0], [0], [1], [0, 0, 1, 1], [], []>} : vector<2x20xf32>, vector<20x20xf32>, vector<2x20xf32> -> vector<2x20xf32>
    %12 = arith.addf %10, %11 : vector<2x20xf32>
    %13 = math.tanh %12 : vector<2x20xf32>
    %c0_i32 = arith.constant 0 : i32
    %14 = vector.broadcast %c0_i32 : i32 to vector<16x20xi32>
    %15 = arith.cmpi eq, %7, %14 : vector<16x20xi32>
    %16 = vector.extract_strided_slice %13 {offsets = [0, 0], sizes = [1, 20], strides = [1, 1]} : vector<2x20xf32> to vector<1x20xf32>
    %17 = vector.shape_cast %16 : vector<1x20xf32> to vector<1x20xf32>
    %18 = vector.broadcast %17 : vector<1x20xf32> to vector<16x20xf32>
    %19 = arith.select %15, %18, %9 : vector<16x20xi1>, vector<16x20xf32>
    %c8_i32 = arith.constant 8 : i32
    %20 = vector.broadcast %c8_i32 : i32 to vector<16x20xi32>
    %21 = arith.cmpi eq, %7, %20 : vector<16x20xi32>
    %22 = vector.extract_strided_slice %13 {offsets = [1, 0], sizes = [1, 20], strides = [1, 1]} : vector<2x20xf32> to vector<1x20xf32>
    %23 = vector.shape_cast %22 : vector<1x20xf32> to vector<1x20xf32>
    %24 = vector.broadcast %23 : vector<1x20xf32> to vector<16x20xf32>
    %25 = arith.select %21, %24, %19 : vector<16x20xi1>, vector<16x20xf32>
    %26 = vector.extract_strided_slice %5 {offsets = [2, 0], sizes = [2, 20], strides = [1, 1]} : vector<16x20xf32> to vector<2x20xf32>
    %cst_10 = arith.constant dense<0.000000e+00> : vector<2x20xf32>
    %27 = tpu.matmul %13, %6, %cst_10 {dimension_numbers = #tpu.dot_dimension_numbers<[1], [0], [0], [1], [0, 0, 1, 1], [], []>} : vector<2x20xf32>, vector<20x20xf32>, vector<2x20xf32> -> vector<2x20xf32>
    %28 = arith.addf %26, %27 : vector<2x20xf32>
    %29 = math.tanh %28 : vector<2x20xf32>
    %c1_i32 = arith.constant 1 : i32
    %30 = vector.broadcast %c1_i32 : i32 to vector<16x20xi32>
    %31 = arith.cmpi eq, %7, %30 : vector<16x20xi32>
    %32 = vector.extract_strided_slice %29 {offsets = [0, 0], sizes = [1, 20], strides = [1, 1]} : vector<2x20xf32> to vector<1x20xf32>
    %33 = vector.shape_cast %32 : vector<1x20xf32> to vector<1x20xf32>
    %34 = vector.broadcast %33 : vector<1x20xf32> to vector<16x20xf32>
    %35 = arith.select %31, %34, %25 : vector<16x20xi1>, vector<16x20xf32>
    %c9_i32 = arith.constant 9 : i32
    %36 = vector.broadcast %c9_i32 : i32 to vector<16x20xi32>
    %37 = arith.cmpi eq, %7, %36 : vector<16x20xi32>
    %38 = vector.extract_strided_slice %29 {offsets = [1, 0], sizes = [1, 20], strides = [1, 1]} : vector<2x20xf32> to vector<1x20xf32>
    %39 = vector.shape_cast %38 : vector<1x20xf32> to vector<1x20xf32>
    %40 = vector.broadcast %39 : vector<1x20xf32> to vector<16x20xf32>
    %41 = arith.select %37, %40, %35 : vector<16x20xi1>, vector<16x20xf32>
    %42 = vector.extract_strided_slice %5 {offsets = [4, 0], sizes = [2, 20], strides = [1, 1]} : vector<16x20xf32> to vector<2x20xf32>
    %cst_11 = arith.constant dense<0.000000e+00> : vector<2x20xf32>
    %43 = tpu.matmul %29, %6, %cst_11 {dimension_numbers = #tpu.dot_dimension_numbers<[1], [0], [0], [1], [0, 0, 1, 1], [], []>} : vector<2x20xf32>, vector<20x20xf32>, vector<2x20xf32> -> vector<2x20xf32>
    %44 = arith.addf %42, %43 : vector<2x20xf32>
    %45 = math.tanh %44 : vector<2x20xf32>
    %c2_i32 = arith.constant 2 : i32
    %46 = vector.broadcast %c2_i32 : i32 to vector<16x20xi32>
    %47 = arith.cmpi eq, %7, %46 : vector<16x20xi32>
    %48 = vector.extract_strided_slice %45 {offsets = [0, 0], sizes = [1, 20], strides = [1, 1]} : vector<2x20xf32> to vector<1x20xf32>
    %49 = vector.shape_cast %48 : vector<1x20xf32> to vector<1x20xf32>
    %50 = vector.broadcast %49 : vector<1x20xf32> to vector<16x20xf32>
    %51 = arith.select %47, %50, %41 : vector<16x20xi1>, vector<16x20xf32>
    %c10_i32 = arith.constant 10 : i32
    %52 = vector.broadcast %c10_i32 : i32 to vector<16x20xi32>
    %53 = arith.cmpi eq, %7, %52 : vector<16x20xi32>
    %54 = vector.extract_strided_slice %45 {offsets = [1, 0], sizes = [1, 20], strides = [1, 1]} : vector<2x20xf32> to vector<1x20xf32>
    %55 = vector.shape_cast %54 : vector<1x20xf32> to vector<1x20xf32>
    %56 = vector.broadcast %55 : vector<1x20xf32> to vector<16x20xf32>
    %57 = arith.select %53, %56, %51 : vector<16x20xi1>, vector<16x20xf32>
    %58 = vector.extract_strided_slice %5 {offsets = [6, 0], sizes = [2, 20], strides = [1, 1]} : vector<16x20xf32> to vector<2x20xf32>
    %cst_12 = arith.constant dense<0.000000e+00> : vector<2x20xf32>
    %59 = tpu.matmul %45, %6, %cst_12 {dimension_numbers = #tpu.dot_dimension_numbers<[1], [0], [0], [1], [0, 0, 1, 1], [], []>} : vector<2x20xf32>, vector<20x20xf32>, vector<2x20xf32> -> vector<2x20xf32>
    %60 = arith.addf %58, %59 : vector<2x20xf32>
    %61 = math.tanh %60 : vector<2x20xf32>
    %c3_i32 = arith.constant 3 : i32
    %62 = vector.broadcast %c3_i32 : i32 to vector<16x20xi32>
    %63 = arith.cmpi eq, %7, %62 : vector<16x20xi32>
    %64 = vector.extract_strided_slice %61 {offsets = [0, 0], sizes = [1, 20], strides = [1, 1]} : vector<2x20xf32> to vector<1x20xf32>
    %65 = vector.shape_cast %64 : vector<1x20xf32> to vector<1x20xf32>
    %66 = vector.broadcast %65 : vector<1x20xf32> to vector<16x20xf32>
    %67 = arith.select %63, %66, %57 : vector<16x20xi1>, vector<16x20xf32>
    %c11_i32 = arith.constant 11 : i32
    %68 = vector.broadcast %c11_i32 : i32 to vector<16x20xi32>
    %69 = arith.cmpi eq, %7, %68 : vector<16x20xi32>
    %70 = vector.extract_strided_slice %61 {offsets = [1, 0], sizes = [1, 20], strides = [1, 1]} : vector<2x20xf32> to vector<1x20xf32>
    %71 = vector.shape_cast %70 : vector<1x20xf32> to vector<1x20xf32>
    %72 = vector.broadcast %71 : vector<1x20xf32> to vector<16x20xf32>
    %73 = arith.select %69, %72, %67 : vector<16x20xi1>, vector<16x20xf32>
    %74 = vector.extract_strided_slice %5 {offsets = [8, 0], sizes = [2, 20], strides = [1, 1]} : vector<16x20xf32> to vector<2x20xf32>
    %cst_13 = arith.constant dense<0.000000e+00> : vector<2x20xf32>
    %75 = tpu.matmul %61, %6, %cst_13 {dimension_numbers = #tpu.dot_dimension_numbers<[1], [0], [0], [1], [0, 0, 1, 1], [], []>} : vector<2x20xf32>, vector<20x20xf32>, vector<2x20xf32> -> vector<2x20xf32>
    %76 = arith.addf %74, %75 : vector<2x20xf32>
    %77 = math.tanh %76 : vector<2x20xf32>
    %c4_i32 = arith.constant 4 : i32
    %78 = vector.broadcast %c4_i32 : i32 to vector<16x20xi32>
    %79 = arith.cmpi eq, %7, %78 : vector<16x20xi32>
    %80 = vector.extract_strided_slice %77 {offsets = [0, 0], sizes = [1, 20], strides = [1, 1]} : vector<2x20xf32> to vector<1x20xf32>
    %81 = vector.shape_cast %80 : vector<1x20xf32> to vector<1x20xf32>
    %82 = vector.broadcast %81 : vector<1x20xf32> to vector<16x20xf32>
    %83 = arith.select %79, %82, %73 : vector<16x20xi1>, vector<16x20xf32>
    %c12_i32 = arith.constant 12 : i32
    %84 = vector.broadcast %c12_i32 : i32 to vector<16x20xi32>
    %85 = arith.cmpi eq, %7, %84 : vector<16x20xi32>
    %86 = vector.extract_strided_slice %77 {offsets = [1, 0], sizes = [1, 20], strides = [1, 1]} : vector<2x20xf32> to vector<1x20xf32>
    %87 = vector.shape_cast %86 : vector<1x20xf32> to vector<1x20xf32>
    %88 = vector.broadcast %87 : vector<1x20xf32> to vector<16x20xf32>
    %89 = arith.select %85, %88, %83 : vector<16x20xi1>, vector<16x20xf32>
    %90 = vector.extract_strided_slice %5 {offsets = [10, 0], sizes = [2, 20], strides = [1, 1]} : vector<16x20xf32> to vector<2x20xf32>
    %cst_14 = arith.constant dense<0.000000e+00> : vector<2x20xf32>
    %91 = tpu.matmul %77, %6, %cst_14 {dimension_numbers = #tpu.dot_dimension_numbers<[1], [0], [0], [1], [0, 0, 1, 1], [], []>} : vector<2x20xf32>, vector<20x20xf32>, vector<2x20xf32> -> vector<2x20xf32>
    %92 = arith.addf %90, %91 : vector<2x20xf32>
    %93 = math.tanh %92 : vector<2x20xf32>
    %c5_i32 = arith.constant 5 : i32
    %94 = vector.broadcast %c5_i32 : i32 to vector<16x20xi32>
    %95 = arith.cmpi eq, %7, %94 : vector<16x20xi32>
    %96 = vector.extract_strided_slice %93 {offsets = [0, 0], sizes = [1, 20], strides = [1, 1]} : vector<2x20xf32> to vector<1x20xf32>
    %97 = vector.shape_cast %96 : vector<1x20xf32> to vector<1x20xf32>
    %98 = vector.broadcast %97 : vector<1x20xf32> to vector<16x20xf32>
    %99 = arith.select %95, %98, %89 : vector<16x20xi1>, vector<16x20xf32>
    %c13_i32 = arith.constant 13 : i32
    %100 = vector.broadcast %c13_i32 : i32 to vector<16x20xi32>
    %101 = arith.cmpi eq, %7, %100 : vector<16x20xi32>
    %102 = vector.extract_strided_slice %93 {offsets = [1, 0], sizes = [1, 20], strides = [1, 1]} : vector<2x20xf32> to vector<1x20xf32>
    %103 = vector.shape_cast %102 : vector<1x20xf32> to vector<1x20xf32>
    %104 = vector.broadcast %103 : vector<1x20xf32> to vector<16x20xf32>
    %105 = arith.select %101, %104, %99 : vector<16x20xi1>, vector<16x20xf32>
    %106 = vector.extract_strided_slice %5 {offsets = [12, 0], sizes = [2, 20], strides = [1, 1]} : vector<16x20xf32> to vector<2x20xf32>
    %cst_15 = arith.constant dense<0.000000e+00> : vector<2x20xf32>
    %107 = tpu.matmul %93, %6, %cst_15 {dimension_numbers = #tpu.dot_dimension_numbers<[1], [0], [0], [1], [0, 0, 1, 1], [], []>} : vector<2x20xf32>, vector<20x20xf32>, vector<2x20xf32> -> vector<2x20xf32>
    %108 = arith.addf %106, %107 : vector<2x20xf32>
    %109 = math.tanh %108 : vector<2x20xf32>
    %c6_i32 = arith.constant 6 : i32
    %110 = vector.broadcast %c6_i32 : i32 to vector<16x20xi32>
    %111 = arith.cmpi eq, %7, %110 : vector<16x20xi32>
    %112 = vector.extract_strided_slice %109 {offsets = [0, 0], sizes = [1, 20], strides = [1, 1]} : vector<2x20xf32> to vector<1x20xf32>
    %113 = vector.shape_cast %112 : vector<1x20xf32> to vector<1x20xf32>
    %114 = vector.broadcast %113 : vector<1x20xf32> to vector<16x20xf32>
    %115 = arith.select %111, %114, %105 : vector<16x20xi1>, vector<16x20xf32>
    %c14_i32 = arith.constant 14 : i32
    %116 = vector.broadcast %c14_i32 : i32 to vector<16x20xi32>
    %117 = arith.cmpi eq, %7, %116 : vector<16x20xi32>
    %118 = vector.extract_strided_slice %109 {offsets = [1, 0], sizes = [1, 20], strides = [1, 1]} : vector<2x20xf32> to vector<1x20xf32>
    %119 = vector.shape_cast %118 : vector<1x20xf32> to vector<1x20xf32>
    %120 = vector.broadcast %119 : vector<1x20xf32> to vector<16x20xf32>
    %121 = arith.select %117, %120, %115 : vector<16x20xi1>, vector<16x20xf32>
    %122 = vector.extract_strided_slice %5 {offsets = [14, 0], sizes = [2, 20], strides = [1, 1]} : vector<16x20xf32> to vector<2x20xf32>
    %cst_16 = arith.constant dense<0.000000e+00> : vector<2x20xf32>
    %123 = tpu.matmul %109, %6, %cst_16 {dimension_numbers = #tpu.dot_dimension_numbers<[1], [0], [0], [1], [0, 0, 1, 1], [], []>} : vector<2x20xf32>, vector<20x20xf32>, vector<2x20xf32> -> vector<2x20xf32>
    %124 = arith.addf %122, %123 : vector<2x20xf32>
    %125 = math.tanh %124 : vector<2x20xf32>
    %c7_i32 = arith.constant 7 : i32
    %126 = vector.broadcast %c7_i32 : i32 to vector<16x20xi32>
    %127 = arith.cmpi eq, %7, %126 : vector<16x20xi32>
    %128 = vector.extract_strided_slice %125 {offsets = [0, 0], sizes = [1, 20], strides = [1, 1]} : vector<2x20xf32> to vector<1x20xf32>
    %129 = vector.shape_cast %128 : vector<1x20xf32> to vector<1x20xf32>
    %130 = vector.broadcast %129 : vector<1x20xf32> to vector<16x20xf32>
    %131 = arith.select %127, %130, %121 : vector<16x20xi1>, vector<16x20xf32>
    %c15_i32 = arith.constant 15 : i32
    %132 = vector.broadcast %c15_i32 : i32 to vector<16x20xi32>
    %133 = arith.cmpi eq, %7, %132 : vector<16x20xi32>
    %134 = vector.extract_strided_slice %125 {offsets = [1, 0], sizes = [1, 20], strides = [1, 1]} : vector<2x20xf32> to vector<1x20xf32>
    %135 = vector.shape_cast %134 : vector<1x20xf32> to vector<1x20xf32>
    %136 = vector.broadcast %135 : vector<1x20xf32> to vector<16x20xf32>
    %137 = arith.select %133, %136, %131 : vector<16x20xi1>, vector<16x20xf32>
    %c0_17 = arith.constant 0 : index
    %c0_18 = arith.constant 0 : index
    %138 = vector.load %arg5[%c0_17, %c0_18] : memref<20x8xf32, #tpu.memory_space<vmem>>, vector<20x8xf32>
    %cst_19 = arith.constant dense<0.000000e+00> : vector<16x8xf32>
    %139 = tpu.matmul %137, %138, %cst_19 {dimension_numbers = #tpu.dot_dimension_numbers<[1], [0], [0], [1], [0, 0, 1, 1], [], []>} : vector<16x20xf32>, vector<20x8xf32>, vector<16x8xf32> -> vector<16x8xf32>
    %c0_20 = arith.constant 0 : index
    %c0_21 = arith.constant 0 : index
    %140 = vector.load %arg6[%c0_20, %c0_21] : memref<1x8xf32, #tpu.memory_space<vmem>>, vector<1x8xf32>
    %141 = vector.broadcast %140 : vector<1x8xf32> to vector<16x8xf32>
    %142 = arith.addf %139, %141 : vector<16x8xf32>
    %c0_22 = arith.constant 0 : index
    %c0_23 = arith.constant 0 : index
    %143 = vector.load %arg7[%c0_22, %c0_23] : memref<16x8xf32, #tpu.memory_space<vmem>>, vector<16x8xf32>
    tpu.vector_store %arg7[%c0_22, %c0_23], %142 {strides = array<i32>} : memref<16x8xf32, #tpu.memory_space<vmem>>, vector<16x8xf32>,
    return
  }
  func.func @transform_0(%arg0: i32) -> (i32, i32) {
    %c0_i32 = arith.constant 0 : i32
    %c0_i32_0 = arith.constant 0 : i32
    %c0_i32_1 = arith.constant 0 : i32
    return %c0_i32, %c0_i32_0 : i32, i32
  }
  func.func @transform_1(%arg0: i32) -> (i32, i32) {
    %c0_i32 = arith.constant 0 : i32
    %c0_i32_0 = arith.constant 0 : i32
    %c0_i32_1 = arith.constant 0 : i32
    return %c0_i32, %c0_i32_0 : i32, i32
  }
  func.func @transform_2(%arg0: i32) -> (i32, i32) {
    %c0_i32 = arith.constant 0 : i32
    %c0_i32_0 = arith.constant 0 : i32
    %c0_i32_1 = arith.constant 0 : i32
    return %c0_i32, %c0_i32_0 : i32, i32
  }
  func.func @transform_3(%arg0: i32) -> (i32, i32) {
    %c0_i32 = arith.constant 0 : i32
    %c0_i32_0 = arith.constant 0 : i32
    %c0_i32_1 = arith.constant 0 : i32
    return %c0_i32, %c0_i32_0 : i32, i32
  }
  func.func @transform_4(%arg0: i32) -> (i32, i32) {
    %c0_i32 = arith.constant 0 : i32
    %c0_i32_0 = arith.constant 0 : i32
    %c0_i32_1 = arith.constant 0 : i32
    return %c0_i32, %c0_i32_0 : i32, i32
  }
  func.func @transform_5(%arg0: i32) -> (i32, i32) {
    %c0_i32 = arith.constant 0 : i32
    %c0_i32_0 = arith.constant 0 : i32
    %c0_i32_1 = arith.constant 0 : i32
    return %c0_i32, %c0_i32_0 : i32, i32
  }
  func.func @transform_6(%arg0: i32) -> (i32, i32) {
    %c0_i32 = arith.constant 0 : i32
    %c0_i32_0 = arith.constant 0 : i32
    %c0_i32_1 = arith.constant 0 : i32
    return %c0_i32, %c0_i32_0 : i32, i32
  }
}

</mosaic_0001>

<bundles_post_ra>
// kernel: eq.8
= control target key start
LH: loop header
LB: loop body
LE: loop exit
PB: predicated region body
PF: predicated region fallthrough
CT: control target
= control target key end

     0   :  { %s67_s10 = smov 14   ;;  %s68_s11 = smov 10   ;;  %vm3_vm0 = vcmask 15360   ;;  %vm9_vm1 = vcmask 130160   ;;  %vm15_vm2 = vcmask 113760   ;;  %vm21_vm3 = vcmask 97360   ;;  %s111_s0 = inlined_call_operand.vmem [shape: s32[8,2], index: 0, kind: input, shape index: {}]   ;;  %s112_s1 = inlined_call_operand.vmem [shape: s32[16], index: 1, kind: output, shape index: {}]  }
   0x1   :  { %v53_v0 = vld [vmem:[%s111_s0 + $0x7] sm:$0x1]   ;;  %v55_v1 = vld [vmem:[%s111_s0 + $0x5] sm:$0x1]   ;;  %v54_v2 = vld [vmem:[%s111_s0 + $0x6] sm:$0x1]  }
   0x2   :  { %7 = vrot.lane.b32.xlu0 %v53_v0, %s67_s10  ;;  %19 = vrot.lane.b32.xlu1 %v55_v1, %s68_s11  ;;  %v56_v3 = vld [vmem:[%s111_s0 + $0x4] sm:$0x1]   ;;  %v2_v4 = vld [vmem:[%s111_s0] sm:$0x1]   ;;  %s69_s18 = smov 12   ;;  %s70_s19 = smov 8  }
   0x3   :  { %4 = vst.msk [vmem:[#allocation0] sm:$0x1] %vm3_vm0, %v2_v4   ;;  %v57_v5 = vld [vmem:[%s111_s0 + $0x3] sm:$0x1]   ;;  %v58_v6 = vld [vmem:[%s111_s0 + $0x2] sm:$0x1]  }
   0x4   :  { %s71_s24 = smov 6   ;;  %s72_s25 = smov 4   ;;  %v59_v7 = vld [vmem:[%s111_s0 + $0x1] sm:$0x1]   ;;  %vm27_vm4 = vcmask 80960   ;;  %vm33_vm5 = vcmask 64560  }
   0x5   :  { %s73_s0 = smov 2   ;;  %vm39_vm6 = vcmask 48160   ;;  %vm45_vm7 = vcmask 31760  }
   0x6   :  { %13 = vrot.lane.b32.xlu0 %v54_v2, %s69_s18  ;;  %25 = vrot.lane.b32.xlu1 %v56_v3, %s70_s19 }
   0xa   :  { %31 = vrot.lane.b32.xlu0 %v57_v5, %s71_s24  ;;  %37 = vrot.lane.b32.xlu1 %v58_v6, %s72_s25 }
   0xe   :  { %43 = vrot.lane.b32.xlu0 %v59_v7, %s73_s0 }
  0x74   :  { %v8_v8 = vpop.permute.xlu0 %7   ;;  %v20_v9 = vpop.permute.xlu1 %19  }
  0x75   :  { %10 = vst.msk [vmem:[#allocation0] sm:$0x1] %vm9_vm1, %v8_v8  }
  0x78   :  { %v14_v10 = vpop.permute.xlu0 %13   ;;  %v26_v11 = vpop.permute.xlu1 %25  }
  0x79   :  { %16 = vst.msk [vmem:[#allocation0] sm:$0x1] %vm15_vm2, %v14_v10  }
  0x7a   :  { %22 = vst.msk [vmem:[#allocation0] sm:$0x1] %vm21_vm3, %v20_v9  }
  0x7b   :  { %28 = vst.msk [vmem:[#allocation0] sm:$0x1] %vm27_vm4, %v26_v11  }
  0x7c   :  { %v32_v12 = vpop.permute.xlu0 %31   ;;  %v38_v13 = vpop.permute.xlu1 %37  }
  0x7d   :  { %34 = vst.msk [vmem:[#allocation0] sm:$0x1] %vm33_vm5, %v32_v12  }
  0x7e   :  { %40 = vst.msk [vmem:[#allocation0] sm:$0x1] %vm39_vm6, %v38_v13  }
  0x80   :  { %v44_v14 = vpop.permute.xlu0 %43  }
  0x81   :  { %46 = vst.msk [vmem:[#allocation0] sm:$0x1] %vm45_vm7, %v44_v14  }
  0x88   :  { %v50_v15 = vld [vmem:[#allocation0] sm:$0x1] }
  0x89   :  { %52 = vst [vmem:[%s112_s1] sm:$0x1] %v50_v15 }

// kernel: net_forward.1
= control target key start
LH: loop header
LB: loop body
LE: loop exit
PB: predicated region body
PF: predicated region fallthrough
CT: control target
= control target key end

     0   :  { %vm33_vm0 = vcmask 64512   ;;  %v1172_v1 = vmov 0.0|0.0   ;;  %vm1173_vm1 = vmmov 0   ;;  %v1174_v7 = vmov 0.0   ;;  %s1398_s1 = inlined_call_operand.vmem [shape: f32[8,20], index: 1, kind: input, shape index: {}]   ;;  %s1399_s0 = inlined_call_operand.vmem [shape: f32[16,8], index: 0, kind: input, shape index: {}]   ;;  %s1400_s2 = inlined_call_operand.vmem [shape: f32[20,20], index: 2, kind: input, shape index: {}]   ;;  %s1401_s3 = inlined_call_operand.vmem [shape: f32[1,20], index: 3, kind: input, shape index: {}]   ;;  %s1402_s4 = inlined_call_operand.vmem [shape: f32[20,8], index: 4, kind: input, shape index: {}]   ;;  %s1403_s5 = inlined_call_operand.vmem [shape: f32[1,8], index: 5, kind: input, shape index: {}]   ;;  %s1404_s6 = inlined_call_operand.vmem [shape: f32[16,8], index: 6, kind: output, shape index: {}]  }
   0x1   :  { %v25_v0 = vld [vmem:[%s1398_s1] sm:$0xff]  ;;  %1125 = vmatprep.subr.bf16.mxu1 %v1172_v1  ;;  %v24_v3 = vld [vmem:[%s1399_s0 + $0x8] sm:$0xff]  ;;  %1050 = vmatprep.mubr.msk.f32.mxu1 %vm1173_vm1, %v1174_v7  ;;  %v1239_v8 = vld [vmem:[%s1400_s2 + $0x10] sm:$0xf]  ;;  %vm125_vm2 = vcmask 1043456   ;;  %vm121_vm3 = vcmask 162816   ;;  %v118_v21 = vlaneseq }
   0x2   :  { %v23_v2 = vld [vmem:[%s1399_s0] sm:$0xff]  ;;  %1039 = vmatprep.subr.mxu0 %v25_v0  ;;  %v116_v5 = vld [vmem:[%s1400_s2 + $0x8] sm:$0xff] }
   0x3   :  { %1041 = vmatprep.mubr.msk.f32.mxu0 %vm33_vm0, %v23_v2  ;;  %v115_v4 = vld [vmem:[%s1400_s2] sm:$0xff]  ;;  %1040 = vmatpush3.msra.mxu0 %v25_v0  ;;  %v1275_v23 = vshrl.u32 %v118_v21, 7 }
   0x4   :  { %v1227_v6 = vpack.c.bf16 %v116_v5, %v115_v4  ;;  %1042 = vmatmul.mubr.msk.f32.vlgmr.msra.gmra.mrb[0].mxu0 %vm33_vm0, %v24_v3  ;;  %1128 = vmatprep.subr.bf16.mxu0 %v1172_v1  ;;  %v977_v9 = vld [vmem:[%s1401_s3] ss:$0 sm:$0xff] }
   0x5   :  { %1059 = vmatprep.mubr.msk.f32.mxu0 %vm1173_vm1, %v1174_v7  ;;  %v205_v24 = vsub.s32 0, %v1275_v23  ;;  %v213_v25 = vsub.s32 1, %v1275_v23  ;;  %v1280_v26 = vadd.s32 8, %v1275_v23  ;;  %v299_v27 = vsub.s32 2, %v1275_v23 }
   0x6   :  { %1127 = vmatpush3.bf16.msra.mxu1 %v1227_v6  ;;  %1130 = vmatpush3.bf16.msra.mxu0 %v1227_v6  ;;  %v307_v28 = vsub.s32 3, %v1275_v23  ;;  %vm201_vm4 = vcmp.eq.s32.totalorder %v1275_v23, 0  ;;  %vm295_vm6 = vcmp.eq.s32.totalorder %v1275_v23, 1  ;;  %v394_v43 = vsub.s32 4, %v1275_v23 }
   0x7   :  { %1048 = vmatprep.subr.mxu1 %v1174_v7  ;;  %1057 = vmatprep.subr.mxu0 %v1174_v7  ;;  %vm210_vm5 = vcmp.eq.s32.totalorder %v1280_v26, 8  ;;  %vm304_vm7 = vcmp.eq.s32.totalorder %v1280_v26, 9  ;;  %v402_v44 = vsub.s32 5, %v1275_v23  ;;  %vm390_vm8 = vcmp.eq.s32.totalorder %v1275_v23, 2 }
   0x8   :  { %vm399_vm9 = vcmp.eq.s32.totalorder %v1280_v26, 10  ;;  %v489_v55 = vsub.s32 6, %v1275_v23  ;;  %v497_v56 = vsub.s32 7, %v1275_v23  ;;  %vm485_vm10 = vcmp.eq.s32.totalorder %v1275_v23, 3 }
   0x9   :  { %vm494_vm11 = vcmp.eq.s32.totalorder %v1280_v26, 11  ;;  %vm577_vm12 = vcmp.eq.s32.totalorder %v1275_v23, 4  ;;  %vm586_vm13 = vcmp.eq.s32.totalorder %v1280_v26, 12  ;;  %vm671_vm14 = vcmp.eq.s32.totalorder %v1275_v23, 5 }
   0xa   :  { %1049 = vmatpush3.msk.msra.mxu1 %vm125_vm2, %v1239_v8  ;;  %1058 = vmatpush3.msk.msra.mxu0 %vm125_vm2, %v1239_v8  ;;  %vm680_vm15 = vcmp.eq.s32.totalorder %v1280_v26, 13 }
   0xb   :  { %1051 = vmatmul.mubr.f32.vlgmr.msra.gmra.mrb[0].mxu1 %v1174_v7  ;;  %1131 = vmatprep.subr.bf16.mxu1 %v1172_v1 }
   0xc   :  { %1133 = vmatpush3.bf16.msra.mxu1 %v1227_v6  ;;  %1068 = vmatprep.mubr.msk.f32.mxu1 %vm1173_vm1, %v1174_v7 }
   0xd   :  { %1066 = vmatprep.subr.mxu1 %v1174_v7  ;;  %1134 = vmatprep.subr.bf16.mxu0 %v1172_v1 }
  0x10   :  { %1067 = vmatpush3.msk.msra.mxu1 %vm125_vm2, %v1239_v8 }
  0x11   :  { %1137 = vmatprep.subr.bf16.mxu1 %v1172_v1 }
  0xd7   :  { %v1043_v10 = vpop.f32.mrb[0].mxu0 }
  0xd8   :  { %v1261_v11 = vadd.f32 %v1043_v10, %v977_v9  ;;  %v106_v12 = vpop.f32.mrb[1].mxu0 }
  0xd9   :  { %v1263_v13 = vadd.f32 %v977_v9, %v106_v12 }
  0xde   :  { %v195_v14 = vpop.f32.mrb[0].mxu1 }
  0xdf   :  { %v199_v15 = vadd.f32 %v195_v14, %v1263_v13  ;;  %v1052_v16 = vpop.f32.mrb[1].mxu1 }
  0xe1   :  { %1156 = vtanh.f32 %v199_v15 }
  0xeb   :  { %v1157_v17 = vpop.eup %1156 }
  0xec   :  { %1060 = vmatmul.mubr.msk.f32.vlgmr.msra.gmra.mrb[2].mxu0 %vm121_vm3, %v1157_v17  ;;  %v206_v29 = vrot.slane %v1157_v17, %v205_v24  ;;  %v214_v30 = vrot.slane %v1157_v17, %v213_v25 }
  0xed   :  { %1136 = vmatpush3.bf16.msra.mxu0 %v1227_v6  ;;  %1077 = vmatprep.mubr.msk.f32.mxu0 %vm1173_vm1, %v1174_v7 }
  0xee   :  { %1075 = vmatprep.subr.mxu0 %v1174_v7  ;;  %v207_v35 = vsel %vm201_vm4, %v206_v29, 0.0  ;;  %v216_v36 = vsel %vm210_vm5, %v214_v30, 0.0  ;;  %vm775_vm4 = vcmp.eq.s32.totalorder %v1280_v26, 14  ;;  %v877_v30 = vld [vmem:[%s1402_s4] sm:$0xff]  ;;  %vm861_vm5 = vcmp.eq.s32.totalorder %v1275_v23, 7 }
  0xf1   :  { %1076 = vmatpush3.msk.msra.mxu0 %vm125_vm2, %v1239_v8 }
  0xf2   :  { %1140 = vmatprep.subr.bf16.mxu0 %v1172_v1 }
 0x1bf   :  { %v286_v18 = vpop.f32.mrb[2].mxu0 }
 0x1c0   :  { %v291_v19 = vrot.slane %v286_v18, 6  ;;  %v1061_v20 = vpop.f32.mrb[3].mxu0 }
 0x1c2   :  { %v293_v22 = vadd.f32 %v291_v19, %v1263_v13 }
 0x1c4   :  { %1158 = vtanh.f32 %v293_v22 }
 0x1ce   :  { %v1159_v31 = vpop.eup %1158 }
 0x1cf   :  { %v312_v32 = vrot.slane %v1159_v31, 2  ;;  %v300_v33 = vrot.slane %v1159_v31, %v299_v27  ;;  %v308_v34 = vrot.slane %v1159_v31, %v307_v28  ;;  %v878_v31 = vld [vmem:[%s1402_s4 + $0x8] sm:$0xff] }
 0x1d1   :  { %1069 = vmatmul.mubr.msk.f32.vlgmr.msra.gmra.mrb[2].mxu1 %vm121_vm3, %v312_v32  ;;  %v301_v37 = vsel %vm295_vm6, %v300_v33, %v207_v35  ;;  %v310_v38 = vsel %vm304_vm7, %v308_v34, %v216_v36  ;;  %v1149_v32 = vpack.c.bf16 %v878_v31, %v877_v30  ;;  %v879_v33 = vld [vmem:[%s1402_s4 + $0x10] sm:$0xf]  ;;  %vm870_vm6 = vcmp.eq.s32.totalorder %v1280_v26, 15 }
 0x1d2   :  { %1139 = vmatpush3.bf16.msra.mxu1 %v1227_v6  ;;  %1086 = vmatprep.mubr.msk.f32.mxu1 %vm1173_vm1, %v1174_v7 }
 0x1d3   :  { %1084 = vmatprep.subr.mxu1 %v1174_v7 }
 0x1d6   :  { %1085 = vmatpush3.msk.msra.mxu1 %vm125_vm2, %v1239_v8 }
 0x1d7   :  { %1143 = vmatprep.subr.bf16.mxu1 %v1172_v1 }
 0x2a4   :  { %v381_v39 = vpop.f32.mrb[2].mxu1 }
 0x2a5   :  { %v386_v40 = vrot.slane %v381_v39, 4  ;;  %v1070_v41 = vpop.f32.mrb[3].mxu1 }
 0x2a7   :  { %v388_v42 = vadd.f32 %v386_v40, %v1263_v13 }
 0x2a9   :  { %1160 = vtanh.f32 %v388_v42 }
 0x2b3   :  { %v1161_v45 = vpop.eup %1160 }
 0x2b4   :  { %v407_v46 = vrot.slane %v1161_v45, 4  ;;  %v395_v47 = vrot.slane %v1161_v45, %v394_v43  ;;  %v403_v48 = vrot.slane %v1161_v45, %v402_v44 }
 0x2b6   :  { %1078 = vmatmul.mubr.msk.f32.vlgmr.msra.gmra.mrb[4].mxu0 %vm121_vm3, %v407_v46  ;;  %v396_v49 = vsel %vm390_vm8, %v395_v47, %v301_v37  ;;  %v405_v50 = vsel %vm399_vm9, %v403_v48, %v310_v38 }
 0x2b7   :  { %1142 = vmatpush3.bf16.msra.mxu0 %v1227_v6  ;;  %1095 = vmatprep.mubr.msk.f32.mxu0 %vm1173_vm1, %v1174_v7 }
 0x2b8   :  { %1093 = vmatprep.subr.mxu0 %v1174_v7 }
 0x2bb   :  { %1094 = vmatpush3.msk.msra.mxu0 %vm125_vm2, %v1239_v8 }
 0x2bc   :  { %1146 = vmatprep.subr.bf16.mxu0 %v1172_v1 }
 0x389   :  { %v476_v51 = vpop.f32.mrb[4].mxu0 }
 0x38a   :  { %v481_v52 = vrot.slane %v476_v51, 2  ;;  %v1079_v53 = vpop.f32.mrb[5].mxu0 }
 0x38c   :  { %v483_v54 = vadd.f32 %v481_v52, %v1263_v13 }
 0x38e   :  { %1162 = vtanh.f32 %v483_v54 }
 0x398   :  { %v1163_v57 = vpop.eup %1162 }
 0x399   :  { %v502_v58 = vrot.slane %v1163_v57, 6  ;;  %v490_v59 = vrot.slane %v1163_v57, %v489_v55  ;;  %v498_v60 = vrot.slane %v1163_v57, %v497_v56 }
 0x39b   :  { %1087 = vmatmul.mubr.msk.f32.vlgmr.msra.gmra.mrb[4].mxu1 %vm121_vm3, %v502_v58  ;;  %v491_v61 = vsel %vm485_vm10, %v490_v59, %v396_v49  ;;  %v500_v62 = vsel %vm494_vm11, %v498_v60, %v405_v50 }
 0x39c   :  { %1145 = vmatpush3.bf16.msra.mxu1 %v1227_v6  ;;  %1104 = vmatprep.mubr.msk.f32.mxu1 %vm1173_vm1, %v1174_v7 }
 0x39d   :  { %1102 = vmatprep.subr.mxu1 %v1174_v7 }
 0x3a0   :  { %1103 = vmatpush3.msk.msra.mxu1 %vm125_vm2, %v1239_v8 }
 0x3a1   :  { %1150 = vmatprep.subr.bf16.mxu1 %v1149_v32 }
 0x46e   :  { %v571_v63 = vpop.f32.mrb[4].mxu1 }
 0x46f   :  { %v575_v0 = vadd.f32 %v571_v63, %v1261_v11  ;;  %v1088_v1 = vpop.f32.mrb[5].mxu1 }
 0x471   :  { %1164 = vtanh.f32 %v575_v0 }
 0x47b   :  { %v1165_v2 = vpop.eup %1164 }
 0x47c   :  { %1096 = vmatmul.mubr.msk.f32.vlgmr.msra.gmra.mrb[6].mxu0 %vm121_vm3, %v1165_v2  ;;  %v582_v3 = vrot.slane %v1165_v2, %v205_v24  ;;  %v590_v4 = vrot.slane %v1165_v2, %v213_v25 }
 0x47d   :  { %1148 = vmatpush3.bf16.msra.mxu0 %v1227_v6  ;;  %1113 = vmatprep.mubr.msk.f32.mxu0 %vm1173_vm1, %v1174_v7  ;;  %vm766_vm1 = vcmp.eq.s32.totalorder %v1275_v23, 6 }
 0x47e   :  { %1111 = vmatprep.subr.mxu0 %v1174_v7  ;;  %v583_v5 = vsel %vm577_vm12, %v582_v3, %v491_v61  ;;  %v592_v9 = vsel %vm586_vm13, %v590_v4, %v500_v62 }
 0x481   :  { %1112 = vmatpush3.msk.msra.mxu0 %vm125_vm2, %v1239_v8 }
 0x54f   :  { %v662_v10 = vpop.f32.mrb[6].mxu0 }
 0x550   :  { %v667_v12 = vrot.slane %v662_v10, 6  ;;  %v1097_v13 = vpop.f32.mrb[7].mxu0 }
 0x552   :  { %v669_v14 = vadd.f32 %v667_v12, %v1261_v11 }
 0x554   :  { %1166 = vtanh.f32 %v669_v14 }
 0x55e   :  { %v1167_v15 = vpop.eup %1166 }
 0x55f   :  { %v688_v6 = vrot.slane %v1167_v15, 2  ;;  %v676_v7 = vrot.slane %v1167_v15, %v299_v27  ;;  %v684_v16 = vrot.slane %v1167_v15, %v307_v28 }
 0x561   :  { %1105 = vmatmul.mubr.msk.f32.vlgmr.msra.gmra.mrb[6].mxu1 %vm121_vm3, %v688_v6  ;;  %v677_v8 = vsel %vm671_vm14, %v676_v7, %v583_v5  ;;  %v686_v17 = vsel %vm680_vm15, %v684_v16, %v592_v9 }
 0x562   :  { %1152 = vmatpush3.bf16.msra.mxu1 %v1149_v32 }
 0x563   :  { %1120 = vmatprep.subr.msk.mxu1 %vm125_vm2, %v879_v33 }
 0x566   :  { %1121 = vmatpush3.msk.msra.mxu1 %vm125_vm2, %v879_v33 }
 0x634   :  { %v757_v18 = vpop.f32.mrb[6].mxu1 }
 0x635   :  { %v762_v19 = vrot.slane %v757_v18, 4  ;;  %v1106_v20 = vpop.f32.mrb[7].mxu1 }
 0x637   :  { %v764_v21 = vadd.f32 %v762_v19, %v1261_v11 }
 0x639   :  { %1168 = vtanh.f32 %v764_v21 }
 0x643   :  { %v1169_v22 = vpop.eup %1168 }
 0x644   :  { %v783_v24 = vrot.slane %v1169_v22, 4  ;;  %v771_v25 = vrot.slane %v1169_v22, %v394_v43  ;;  %v779_v27 = vrot.slane %v1169_v22, %v402_v44 }
 0x646   :  { %1114 = vmatmul.mubr.msk.f32.vlgmr.msra.gmra.mrb[8].mxu0 %vm121_vm3, %v783_v24  ;;  %v772_v28 = vsel %vm766_vm1, %v771_v25, %v677_v8  ;;  %v781_v29 = vsel %vm775_vm4, %v779_v27, %v686_v17 }
 0x719   :  { %v852_v34 = vpop.f32.mrb[8].mxu0 }
 0x71a   :  { %v857_v35 = vrot.slane %v852_v34, 2  ;;  %v1115_v36 = vpop.f32.mrb[9].mxu0 }
 0x71c   :  { %v859_v37 = vadd.f32 %v857_v35, %v1261_v11  ;;  %v995_v11 = vld [vmem:[%s1403_s5] ss:$0 sm:$0xff] }
 0x71e   :  { %1170 = vtanh.f32 %v859_v37 }
 0x728   :  { %v1171_v38 = vpop.eup %1170 }
 0x729   :  { %v866_v39 = vrot.slane %v1171_v38, %v489_v55  ;;  %v874_v40 = vrot.slane %v1171_v38, %v497_v56 }
 0x72b   :  { %v867_v41 = vsel %vm861_vm5, %v866_v39, %v772_v28  ;;  %v876_v42 = vsel %vm870_vm6, %v874_v40, %v781_v29 }
 0x72c   :  { %1122 = vmatprep.mubr.msk.f32.mxu1 %vm121_vm3, %v867_v41 }
 0x72d   :  { %1123 = vmatmul.mubr.msk.f32.vlgmr.msra.gmra.mrb[8].mxu1 %vm121_vm3, %v876_v42 }
 0x800   :  { %v1124_v43 = vpop.f32.mrb[8].mxu1 }
 0x801   :  { %v968_v44 = vadd.f32 %v1124_v43, %v995_v11  ;;  %v962_v45 = vpop.f32.mrb[9].mxu1 }
 0x802   :  { %v963_v26 = vadd.f32 %v995_v11, %v962_v45 }
 0x803   :  { %972 = vst.msk [vmem:[%s1404_s6 + $0x8] sm:$0xff] %vm33_vm0, %v968_v44 }
 0x804   :  { %971 = vst.msk [vmem:[%s1404_s6] sm:$0xff] %vm33_vm0, %v963_v26 }

</bundles_post_ra>
